<compile_context>
chip_gen: v7x
topology: tpu7x:2x2x1
jax: 0.10.0
libtpu: 0.0.40
codegen_flags: <defaults>
</compile_context>

<pallas_src>
import functools

import jax
import jax.numpy as jnp
from jax.experimental import pallas as pl
from jax.experimental.pallas import tpu as pltpu


def _round_up(x: int, m: int) -> int:
    return ((x + m - 1) // m) * m


def _vmem_capacity_bytes() -> int:
    """Per-TensorCore VMEM capacity; conservative (v7x-sized) fallback."""
    try:
        return int(pltpu.get_tpu_info().vmem_capacity_bytes)
    except Exception:
        return 64 << 20


def _patch_proj_kernel(x_ref, w_ref, b_ref, o_ref):
    # x_ref: (tm, K) patch rows, w_ref: (K, tn) weight, b_ref: (1, tn) f32 bias.
    acc = jnp.dot(x_ref[...], w_ref[...], preferred_element_type=jnp.float32)
    o_ref[...] = (acc + b_ref[...]).astype(o_ref.dtype)


def patch_proj_pallas(patches, weight_kn, bias_n, *, tm=512, tn_max=512,
                      out_dtype=None):
    """patches: (M, K), weight_kn: (K, N), bias_n: (N,) -> (M, N)."""
    M, K = patches.shape
    Kw, N = weight_kn.shape
    assert Kw == K
    if out_dtype is None:
        out_dtype = patches.dtype

    x_b = patches.dtype.itemsize
    w_b = weight_kn.dtype.itemsize
    o_b = jnp.dtype(out_dtype).itemsize

    vmem_cap = _vmem_capacity_bytes()
    big_vmem = vmem_cap >= (96 << 20)          # v5e/v6e: 128 MiB (1 TC); v7x: 64 MiB (2 TC)
    resident_thresh = (16 << 20) if big_vmem else (8 << 20)
    vmem_ceiling = (56 << 20) if big_vmem else (48 << 20)

    # --- N tiling (no padding, no post-slice) --------------------------------
    Np = _round_up(N, 128)
    if 2 * K * Np * w_b <= resident_thresh:
        # Whole weight stays resident (2x accounts for pipeline buffering);
        # a full-dim N block is always layout-legal, even when N % 128 != 0
        # (the final store is simply masked on the ragged lanes).
        tn = N
    else:
        tn = min(tn_max, Np)                   # multiple of 128; ragged tail OK
    num_n = pl.cdiv(N, tn)

    # --- M tiling -------------------------------------------------------------
    tm_eff = tm
    if 2 * 1024 * (K * x_b + tn * o_b) <= (8 << 20):
        tm_eff = 1024                           # big tiles ~85% of HBM roofline
    tm_eff = min(tm_eff, _round_up(M, 8))       # ragged last block handled by Pallas

    def _vmem_est(tme):
        return (2 * tme * K * x_b + 2 * K * tn * w_b
                + 2 * tme * tn * o_b + 2 * tn * 4)

    # Shrink only if the double-buffered footprint would blow the VMEM budget.
    while tm_eff > 128 and _vmem_est(tm_eff) > vmem_ceiling - (8 << 20):
        tm_eff = _round_up(tm_eff // 2, 8)

    # v7x-class only: make sure both TensorCores get at least one M block.
    if not big_vmem:
        while tm_eff >= 512 and pl.cdiv(M, tm_eff) < 2:
            tm_eff = _round_up(tm_eff // 2, 8)

    num_m = pl.cdiv(M, tm_eff)
    bias_2d = bias_n.reshape(1, N).astype(jnp.float32)
    vmem_limit = int(min(max(_vmem_est(tm_eff) + (8 << 20), 32 << 20), vmem_ceiling))

    # --- grid / specs -----------------------------------------------------------
    if num_n == 1:
        # Common case: weight + bias DMA'd once, patches stream through once,
        # M is the (only) parallel axis -> megacore splits it on v7x.
        grid = (num_m,)
        in_specs = [pl.BlockSpec((tm_eff, K), lambda i: (i, 0)),
                    pl.BlockSpec((K, tn), lambda i: (0, 0)),
                    pl.BlockSpec((1, tn), lambda i: (0, 0))]
        out_specs = pl.BlockSpec((tm_eff, tn), lambda i: (i, 0))
        dim_sem = ("parallel",)
        x_reads, w_reads = 1, 1
    else:
        # Weight does not fit: pick loop order by re-read volume.
        m_outer = (num_m - 1) * K * N * w_b <= (num_n - 1) * M * K * x_b
        if m_outer:
            grid = (num_m, num_n)
            in_specs = [pl.BlockSpec((tm_eff, K), lambda i, j: (i, 0)),
                        pl.BlockSpec((K, tn), lambda i, j: (0, j)),
                        pl.BlockSpec((1, tn), lambda i, j: (0, j))]
            out_specs = pl.BlockSpec((tm_eff, tn), lambda i, j: (i, j))
            x_reads, w_reads = 1, num_m
        else:
            grid = (num_n, num_m)
            in_specs = [pl.BlockSpec((tm_eff, K), lambda j, i: (i, 0)),
                        pl.BlockSpec((K, tn), lambda j, i: (0, j)),
                        pl.BlockSpec((1, tn), lambda j, i: (0, j))]
            out_specs = pl.BlockSpec((tm_eff, tn), lambda j, i: (i, j))
            x_reads, w_reads = num_n, 1
        dim_sem = ("parallel", "parallel")

    cost = pl.CostEstimate(
        flops=2 * M * K * N,
        transcendentals=0,
        bytes_accessed=(x_reads * M * K * x_b + w_reads * K * N * w_b
                        + M * N * o_b + N * 4),
    )

    return pl.pallas_call(
        _patch_proj_kernel,
        out_shape=jax.ShapeDtypeStruct((M, N), out_dtype),
        grid_spec=pltpu.PrefetchScalarGridSpec(
            num_scalar_prefetch=0,
            grid=grid,
            in_specs=in_specs,
            out_specs=out_specs),
        compiler_params=pltpu.CompilerParams(
            dimension_semantics=dim_sem,
            vmem_limit_bytes=vmem_limit),
        cost_estimate=cost,
    )(patches, weight_kn, bias_2d)


def _forward_impl(latent, w_kn, bias, *, patch_size, embed_dim, compute_dtype):
    # latent: (B, C, T, H, W) — PyTorch layout.
    b, c, t, h, w = latent.shape
    p = patch_size
    nh, nw = h // p, w // p
    # 'b c t h w -> ((b t nh nw), (c ph pw))' as a single transpose (pw stays
    # minor), fused by XLA with the bf16 cast into one copy.
    x = latent.reshape(b, c, t, nh, p, nw, p)
    x = jnp.transpose(x, (0, 2, 3, 5, 1, 4, 6))          # (b, t, nh, nw, c, ph, pw)
    patches = x.reshape(b * t * nh * nw, c * p * p).astype(compute_dtype)

    out = patch_proj_pallas(patches, w_kn, bias, out_dtype=compute_dtype)  # (M, E)
    # '(b t) n c -> b (t n) c'
    return out.reshape(b, t * nh * nw, embed_dim)


_forward = jax.jit(_forward_impl,
                   static_argnames=("patch_size", "embed_dim", "compute_dtype"))


class PatchEmbed2DPallas:
    """JAX/Pallas port of PatchEmbed2D (flatten=True, layer_norm=False, bias=True)."""

    def __init__(self, patch_size=16, in_channels=3, embed_dim=768, key=None,
                 compute_dtype=jnp.bfloat16):
        self.patch_size = patch_size
        self.in_channels = in_channels
        self.embed_dim = embed_dim
        self.compute_dtype = compute_dtype
        if key is None:
            key = jax.random.PRNGKey(0)
        kw, kb = jax.random.split(key)
        fan_in = in_channels * patch_size * patch_size
        bound = 1.0 / (fan_in ** 0.5)
        # nn.Conv2d weight layout: (embed_dim, in_channels, p, p) — f32 master copy.
        self.weight = jax.random.uniform(
            kw, (embed_dim, in_channels, patch_size, patch_size),
            minval=-bound, maxval=bound, dtype=jnp.float32)
        self.bias = jax.random.uniform(
            kb, (embed_dim,), minval=-bound, maxval=bound, dtype=jnp.float32)
        # Precompute the (K, E) matmul layout once, in the compute dtype
        # (bf16 -> native MXU inputs, half the weight read).
        self.w_kn = self.weight.reshape(embed_dim, fan_in).T.astype(compute_dtype)

    def __call__(self, latent):
        b, c, t, h, w = latent.shape
        p = self.patch_size
        assert c == self.in_channels and h % p == 0 and w % p == 0
        return _forward(latent, self.w_kn, self.bias,
                        patch_size=p, embed_dim=self.embed_dim,
                        compute_dtype=self.compute_dtype)

        # TODO(synk): optional LayerNorm (layer_norm=True, elementwise_affine=False)
        # is not implemented; the module default is layer_norm=False.


if __name__ == "__main__":
    key = jax.random.PRNGKey(0)
    k_in, k_par = jax.random.split(key)

    # Small config: b=2, c=4, t=2, h=w=16, patch_size=4, embed_dim=32
    B, C, T, H, W = 2, 4, 2, 16, 16
    P, E = 4, 32

    latent = jax.random.normal(k_in, (B, C, T, H, W), dtype=jnp.float32)

    mod = PatchEmbed2DPallas(patch_size=P, in_channels=C, embed_dim=E, key=k_par)
    out = jax.block_until_ready(mod(latent))

    nh, nw = H // P, W // P
    assert out.shape == (B, T * nh * nw, E)

    # Reference patch matrix (the original two-transpose rearrange, in f32).
    x = jnp.transpose(latent, (0, 2, 1, 3, 4)).reshape(B * T, C, H, W)
    x = x.reshape(B * T, C, nh, P, nw, P)
    x = jnp.transpose(x, (0, 2, 4, 1, 3, 5)).reshape(B * T * nh * nw, C * P * P)

    # (a) Matched-path reference: same bf16 inputs, f32 accumulation.
    ref_bf16 = (jnp.dot(x.astype(jnp.bfloat16), mod.w_kn,
                        preferred_element_type=jnp.float32)
                + mod.bias).astype(mod.compute_dtype)
    ref_bf16 = ref_bf16.reshape(B, T * nh * nw, E)
    assert jnp.allclose(out.astype(jnp.float32), ref_bf16.astype(jnp.float32),
                        atol=1e-2, rtol=1e-2)

    # (b) Loose sanity check against full-f32 math (bf16 rounding tolerance).
    ref_f32 = (x @ mod.weight.reshape(E, C * P * P).T + mod.bias)
    ref_f32 = ref_f32.reshape(B, T * nh * nw, E)
    assert jnp.allclose(out.astype(jnp.float32), ref_f32, atol=5e-2, rtol=5e-2)

    print("KERNEL_OK")
</pallas_src>

<mosaic_0001>
module attributes {stable_mosaic.version = 11 : i64} {
  func.func @_patch_proj_kernel(%arg0: i32, %arg1: memref<64x64xbf16, #tpu.memory_space<vmem>>, %arg2: memref<64x32xbf16, #tpu.memory_space<vmem>>, %arg3: memref<1x32xf32, #tpu.memory_space<vmem>>, %arg4: memref<64x32xbf16, #tpu.memory_space<vmem>>) attributes {dimension_semantics = [#tpu.dimension_semantics<parallel>], iteration_bounds = array<i64: 1>, scalar_prefetch = 0 : i64, scratch_operands = 0 : i64, tpu.core_type = #tpu.core_type<tc>, window_params = [{transform_indices = @transform_0, window_bounds = array<i64: 64, 64>}, {pipeline_mode = #tpu.pipeline_mode<synchronous>, transform_indices = @transform_1, window_bounds = array<i64: 64, 32>}, {pipeline_mode = #tpu.pipeline_mode<synchronous>, transform_indices = @transform_2, window_bounds = array<i64: 1, 32>}, {transform_indices = @transform_3, window_bounds = array<i64: 64, 32>}]} {
    %c0 = arith.constant 0 : index
    %c0_0 = arith.constant 0 : index
    %0 = vector.load %arg1[%c0, %c0_0] : memref<64x64xbf16, #tpu.memory_space<vmem>>, vector<64x64xbf16>
    %c0_1 = arith.constant 0 : index
    %c0_2 = arith.constant 0 : index
    %1 = vector.load %arg2[%c0_1, %c0_2] : memref<64x32xbf16, #tpu.memory_space<vmem>>, vector<64x32xbf16>
    %cst = arith.constant dense<0.000000e+00> : vector<64x32xf32>
    %2 = tpu.matmul %0, %1, %cst {dimension_numbers = #tpu.dot_dimension_numbers<[1], [0], [0], [1], [0, 0, 1, 1], [], []>} : vector<64x64xbf16>, vector<64x32xbf16>, vector<64x32xf32> -> vector<64x32xf32>
    %c0_3 = arith.constant 0 : index
    %c0_4 = arith.constant 0 : index
    %3 = vector.load %arg3[%c0_3, %c0_4] : memref<1x32xf32, #tpu.memory_space<vmem>>, vector<1x32xf32>
    %4 = vector.broadcast %3 : vector<1x32xf32> to vector<64x32xf32>
    %5 = arith.addf %2, %4 : vector<64x32xf32>
    %6 = arith.truncf %5 : vector<64x32xf32> to vector<64x32xbf16>
    %c0_5 = arith.constant 0 : index
    %c0_6 = arith.constant 0 : index
    %7 = vector.load %arg4[%c0_5, %c0_6] : memref<64x32xbf16, #tpu.memory_space<vmem>>, vector<64x32xbf16>
    tpu.vector_store %arg4[%c0_5, %c0_6], %6 {strides = array<i32>} : memref<64x32xbf16, #tpu.memory_space<vmem>>, vector<64x32xbf16>,
    return
  }
  func.func @transform_0(%arg0: i32) -> (i32, i32) {
    %c0_i32 = arith.constant 0 : i32
    %c0_i32_0 = arith.constant 0 : i32
    return %arg0, %c0_i32 : i32, i32
  }
  func.func @transform_1(%arg0: i32) -> (i32, i32) {
    %c0_i32 = arith.constant 0 : i32
    %c0_i32_0 = arith.constant 0 : i32
    %c0_i32_1 = arith.constant 0 : i32
    return %c0_i32, %c0_i32_0 : i32, i32
  }
  func.func @transform_2(%arg0: i32) -> (i32, i32) {
    %c0_i32 = arith.constant 0 : i32
    %c0_i32_0 = arith.constant 0 : i32
    %c0_i32_1 = arith.constant 0 : i32
    return %c0_i32, %c0_i32_0 : i32, i32
  }
  func.func @transform_3(%arg0: i32) -> (i32, i32) {
    %c0_i32 = arith.constant 0 : i32
    %c0_i32_0 = arith.constant 0 : i32
    return %arg0, %c0_i32 : i32, i32
  }
}

</mosaic_0001>

<bundles_post_ra>
// kernel: _forward_impl.1
= control target key start
LH: loop header
LB: loop body
LE: loop exit
PB: predicated region body
PF: predicated region fallthrough
CT: control target
= control target key end

     0   :  { %vm83_vm0 = vcmask 523264   ;;  %s388_s0 = inlined_call_operand.vmem [shape: bf16[64,64], index: 0, kind: input, shape index: {}]   ;;  %s389_s1 = inlined_call_operand.vmem [shape: bf16[64,32], index: 1, kind: input, shape index: {}]   ;;  %s390_s2 = inlined_call_operand.vmem [shape: f32[1,32], index: 2, kind: input, shape index: {}]   ;;  %s391_s3 = inlined_call_operand.hbm [shape: bf16[64,32], index: 3, kind: output, shape index: {}]  }
   0x1   :  { %v282_v0 = vld [vmem:[%s389_s1] sm:$0xff]   ;;  %v283_v1 = vld [vmem:[%s389_s1 + $0x8] sm:$0xff]   ;;  %v284_v2 = vld [vmem:[%s389_s1 + $0x10] sm:$0xff]  }
   0x2   :  { %255 = vmatprep.subr.bf16.mxu0 %v282_v0  ;;  %271 = vmatprep.subr.bf16.mxu1 %v282_v0  ;;  %v286_v3 = vld [vmem:[%s388_s0] sm:$0xff]   ;;  %v287_v4 = vld [vmem:[%s388_s0 + $0x10] sm:$0xff]   ;;  %v285_v5 = vld [vmem:[%s389_s1 + $0x18] sm:$0xff]  }
   0x3   :  { %256 = vmatpush3.bf16.msra.mxu0 %v282_v0  ;;  %275 = vmatpush3.bf16.msra.mxu1 %v282_v0 }
   0x4   :  { %257 = vmatprep.subr.bf16.mxu0 %v283_v1  ;;  %272 = vmatprep.subr.bf16.mxu1 %v283_v1 }
   0x5   :  { %263 = vmatprep.mubr.msk.bf16.mxu0 %vm83_vm0, %v286_v3 }
   0x7   :  { %258 = vmatpush3.bf16.msra.mxu0 %v283_v1  ;;  %276 = vmatpush3.bf16.msra.mxu1 %v283_v1 }
   0x8   :  { %259 = vmatprep.subr.bf16.mxu0 %v284_v2  ;;  %273 = vmatprep.subr.bf16.mxu1 %v284_v2 }
   0x9   :  { %8 = vsyncpa [#allocation3], 0  ;;  %267 = vmatprep.mubr.msk.bf16.mxu1 %vm83_vm0, %v287_v4  ;;  %v288_v6 = vld [vmem:[%s388_s0 + $0x8] sm:$0xff]   ;;  %v289_v7 = vld [vmem:[%s388_s0 + $0x18] sm:$0xff]   ;;  %vm193_vm1 = vcmask 257024   ;;  %s314_s0 = smov [#allocation2]  }
   0xa   :  { %v218_v8 = vld [vmem:[%s390_s2] ss:$0 sm:$0xff]  ;;  %s207_s29 = sshll.u32 %s314_s0, 4  ;;  %s208_s29 = int_to_ptr.vmem [resolvable:$true] %s207_s29 }
   0xb   :  { %260 = vmatpush3.bf16.msra.mxu0 %v284_v2  ;;  %277 = vmatpush3.bf16.msra.mxu1 %v284_v2  ;;  %s290_s2 = scalar_lea.vmem %s208_s29, 512  ;;  %p295_p1 = scmp.lt.s32.totalorder %s208_s29, %s208_s29 }
   0xc   :  { %261 = vmatprep.subr.bf16.mxu0 %v285_v5  ;;  %274 = vmatprep.subr.bf16.mxu1 %v285_v5  ;;  %p291_p0 = scmp.ne.s32.totalorder %s208_s29, %s290_s2  ;;  %p296_p2 = scmp.lt.s32.totalorder %s290_s2, %s290_s2 }
   0xe   :  { %p297_p3 = por %p296_p2, %p295_p1 }
   0xf   :  { %262 = vmatpush3.bf16.msra.mxu0 %v285_v5  ;;  %278 = vmatpush3.bf16.msra.mxu1 %v285_v5 }
  0x10   :  { %p298_p4 = pnand %p297_p3, %p291_p0 }
  0x12   :  { %264 = vmatmul.mubr.msk.bf16.vlgmr.msra.gmra.mrb[0].mxu0 %vm83_vm0, %v288_v6  ;;  %268 = vmatmul.mubr.msk.bf16.vlgmr.msra.gmra.mrb[0].mxu1 %vm83_vm0, %v289_v7 }
  0xe5   :  { %v265_v9 = vpop.f32.mrb[0].mxu0  ;;  %v269_v10 = vpop.f32.mrb[0].mxu1 }
  0xe6   :  { %v139_v11 = vadd.f32 %v265_v9, %v218_v8  ;;  %v155_v12 = vadd.f32 %v269_v10, %v218_v8  ;;  %v130_v13 = vpop.f32.mrb[1].mxu0  ;;  %v146_v14 = vpop.f32.mrb[1].mxu1 }
  0xe7   :  { %v131_v15 = vadd.f32 %v218_v8, %v130_v13  ;;  %v147_v16 = vadd.f32 %v218_v8, %v146_v14  ;;  %v266_v17 = vpop.f32.mrb[2].mxu0  ;;  %v270_v18 = vpop.f32.mrb[2].mxu1 }
  0xe8   :  { %v241_v19 = vpack.c.bf16 %v139_v11, %v139_v11  ;;  %v245_v20 = vpack.c.bf16 %v155_v12, %v155_v12  ;;  %v142_v21 = vadd.f32 %v266_v17, %v218_v8  ;;  %v158_v22 = vadd.f32 %v270_v18, %v218_v8  ;;  %v133_v23 = vpop.f32.mrb[3].mxu0  ;;  %v149_v24 = vpop.f32.mrb[3].mxu1 }
  0xe9   :  { %v239_v25 = vpack.c.bf16 %v131_v15, %v131_v15  ;;  %v243_v26 = vpack.c.bf16 %v147_v16, %v147_v16  ;;  %v134_v27 = vadd.f32 %v218_v8, %v133_v23  ;;  %v150_v28 = vadd.f32 %v218_v8, %v149_v24 }
  0xea   :  { %196 = vst.msk [vmem:[#allocation2 + $0x8] sm:$0xf] %vm193_vm1, %v241_v19  ;;  %200 = vst.msk [vmem:[#allocation2 + $0x18] sm:$0xf] %vm193_vm1, %v245_v20  ;;  %v242_v29 = vpack.c.bf16 %v142_v21, %v142_v21  ;;  %v246_v30 = vpack.c.bf16 %v158_v22, %v158_v22 }
  0xeb   :  { %194 = vst.msk [vmem:[#allocation2] sm:$0xf] %vm193_vm1, %v239_v25  ;;  %198 = vst.msk [vmem:[#allocation2 + $0x10] sm:$0xf] %vm193_vm1, %v243_v26  ;;  %v240_v31 = vpack.c.bf16 %v134_v27, %v134_v27  ;;  %v244_v32 = vpack.c.bf16 %v150_v28, %v150_v28 }
  0xec   :  { %197 = vst.msk [vmem:[#allocation2 + $0xc] sm:$0xf] %vm193_vm1, %v242_v29  ;;  %201 = vst.msk [vmem:[#allocation2 + $0x1c] sm:$0xf] %vm193_vm1, %v246_v30 }
  0xed   :  { %195 = vst.msk [vmem:[#allocation2 + $0x4] sm:$0xf] %vm193_vm1, %v240_v31  ;;  %199 = vst.msk [vmem:[#allocation2 + $0x14] sm:$0xf] %vm193_vm1, %v244_v32 }
  0xee   :  { %301 = shalt.err (!%p298_p4)
}
  0xef   :  { %s302_s5 = scalar_lea.hbm %s391_s3, 512 }
  0xf0   :  { %p303_p5 = scmp.ne.s32.totalorder %s391_s3, %s302_s5  ;;  %p306_p6 = scmp.lt.u32.totalorder %s302_s5, %s391_s3 }
  0xf2   :  { %p308_p7 = pnand %p306_p6, %p303_p5 }
  0xf4   :  { %311 = shalt.err (!%p308_p7)
}
  0xf5   :  { %s315_s10 = smov 64   ;;  %s316_s11 = smov 4  }
  0xf6   :  { %213 = dma.vmem_to_hbm [thread:$0]  %s208_s29, 512, %s391_s3, [#allocation3], %s315_s10, %s315_s10, %s316_s11  }
  0xf7   :  { %312 = dma.done.wait [#allocation3], 512  }
  0xf8   :  { %313 = vsyncadd [#allocation3], 4294966784 }
  0xf9   :  { %217 = vsyncpa [#allocation3], 1 }

</bundles_post_ra>
